<compile_context>
chip_gen: v5e
topology: v5e:2x2
jax: 0.10.0
libtpu: 0.0.40
codegen_flags: <defaults>
</compile_context>

<pallas_src>
import functools

import jax
import jax.numpy as jnp
from jax.experimental import pallas as pl
from jax.experimental.pallas import tpu as pltpu


def _round_up(x: int, m: int) -> int:
    return ((x + m - 1) // m) * m


def _cdiv(a: int, b: int) -> int:
    return (a + b - 1) // b


def _dqn_kernel(x_ref, w1_ref, b1_ref, w2_ref, b2_ref, w3_ref, b3_ref, o_ref):
    """One batch tile: (TM, input_dim) -> (TM, n_actions), f32 accumulation."""
    x = x_ref[...]

    # f1 + ReLU (MXU, f32 accumulate).  astype() is a no-op when dtypes match
    # (pure-f32 path / v5e), and enables bf16 weights on v6e/v7x.
    h1 = jnp.dot(x.astype(w1_ref.dtype), w1_ref[...],
                 preferred_element_type=jnp.float32)
    h1 = jnp.maximum(h1 + b1_ref[...].astype(jnp.float32), 0.0)

    # f2 + ReLU
    h2 = jnp.dot(h1.astype(w2_ref.dtype), w2_ref[...],
                 preferred_element_type=jnp.float32)
    h2 = jnp.maximum(h2 + b2_ref[...].astype(jnp.float32), 0.0)

    # f3 (no activation)
    out = jnp.dot(h2.astype(w3_ref.dtype), w3_ref[...],
                  preferred_element_type=jnp.float32)
    out = out + b3_ref[...].astype(jnp.float32)

    o_ref[...] = out.astype(o_ref.dtype)


@functools.partial(jax.jit, static_argnames=("block_m",))
def dqn_forward(state, w1, b1, w2, b2, w3, b3, *, block_m: int = 4096):
    """state: (B, input_dim) -> actions: (B, n_actions) float32."""
    B, input_dim = state.shape
    n_actions = w3.shape[1]

    # Sublane alignment for the batch-tiled blocks: 8 rows for 32-bit inputs,
    # 16 for bf16 (packed sublanes).
    itemsize = jnp.dtype(state.dtype).itemsize
    row_align = 8 * max(1, 4 // itemsize)

    # Pad the batch only to the row alignment (a few rows at most), never to a
    # whole tile.
    b_aligned = _round_up(B, row_align)

    # Number of batch tiles:
    #   * enough tiles that each is <= block_m rows,
    #   * at least 2 tiles when the batch is reasonably large, so the
    #     "parallel" batch axis can split across v7x's two TensorCores.
    num_tiles = _cdiv(b_aligned, block_m)
    if num_tiles == 1 and b_aligned >= 1024:
        num_tiles = 2
    tm = _round_up(_cdiv(b_aligned, num_tiles), row_align)
    b_pad = num_tiles * tm

    if b_pad != B:
        state = jnp.pad(state, ((0, b_pad - B), (0, 0)))

    def tiled(shape):
        # Batch-tiled operand: block index advances with the grid step.
        return pl.BlockSpec(shape, lambda i: (i, 0))

    def resident(shape):
        # Constant index map: DMA'd once, VMEM-resident across the whole grid.
        return pl.BlockSpec(shape, lambda i: tuple(0 for _ in shape))

    flops = 2 * b_pad * (input_dim * w1.shape[1]
                         + w2.shape[0] * w2.shape[1]
                         + w3.shape[0] * n_actions)
    bytes_accessed = (
        b_pad * input_dim * itemsize
        + sum(int(a.size) * jnp.dtype(a.dtype).itemsize
              for a in (w1, b1, w2, b2, w3, b3))
        + b_pad * n_actions * 4)

    out = pl.pallas_call(
        _dqn_kernel,
        out_shape=jax.ShapeDtypeStruct((b_pad, n_actions), jnp.float32),
        grid=(num_tiles,),
        in_specs=[
            tiled((tm, input_dim)),
            resident(w1.shape), resident(b1.shape),
            resident(w2.shape), resident(b2.shape),
            resident(w3.shape), resident(b3.shape),
        ],
        out_specs=tiled((tm, n_actions)),
        compiler_params=pltpu.CompilerParams(
            dimension_semantics=("parallel",)),
        cost_estimate=pl.CostEstimate(
            flops=flops, transcendentals=0, bytes_accessed=bytes_accessed),
    )(state, w1, b1, w2, b2, w3, b3)

    return out[:B] if b_pad != B else out


def init_dqn_params(key, input_dim, f1_dims, f2_dims, n_actions,
                    dtype=jnp.float32):
    """Mimics PyTorch nn.Linear default init:
    U(-1/sqrt(fan_in), 1/sqrt(fan_in)) for weights and biases.
    Weights stored as (in, out); biases as (1, out).
    Pass dtype=jnp.bfloat16 on v6e/v7x for halved weight/activation HBM
    traffic (keep f32 on v5e)."""
    ks = jax.random.split(key, 6)

    def linear(kw, kb, fan_in, fan_out):
        bound = 1.0 / jnp.sqrt(jnp.float32(fan_in))
        w = jax.random.uniform(kw, (fan_in, fan_out), jnp.float32,
                               -bound, bound).astype(dtype)
        b = jax.random.uniform(kb, (1, fan_out), jnp.float32,
                               -bound, bound).astype(dtype)
        return w, b

    w1, b1 = linear(ks[0], ks[1], input_dim, f1_dims)
    w2, b2 = linear(ks[2], ks[3], f1_dims, f2_dims)
    w3, b3 = linear(ks[4], ks[5], f2_dims, n_actions)
    return w1, b1, w2, b2, w3, b3


if __name__ == "__main__":
    # Shapes consistent with the module: input_dims=(8,), f1=32, f2=32,
    # n_actions=4.
    key = jax.random.PRNGKey(0)
    k_x, k_p, k_x2 = jax.random.split(key, 3)

    input_dim, f1_dims, f2_dims, n_actions = 8, 32, 32, 4
    params = init_dqn_params(k_p, input_dim, f1_dims, f2_dims, n_actions)
    w1, b1, w2, b2, w3, b3 = params

    def reference(s):
        h = jnp.maximum(s @ w1 + b1, 0.0)
        h = jnp.maximum(h @ w2 + b2, 0.0)
        return h @ w3 + b3

    # Small batch: single tile, no padding, no output slice.
    state = jax.random.normal(k_x, (32, input_dim), jnp.float32)
    actions = dqn_forward(state, *params)
    jax.block_until_ready(actions)
    assert actions.shape == (32, n_actions)
    assert jnp.allclose(actions, reference(state), atol=1e-5, rtol=1e-5)

    # Unaligned batch: exercises the few-row pad, the out[:B] slice, and the
    # 2-tile megacore split path (grid=(2,)).
    state2 = jax.random.normal(k_x2, (1037, input_dim), jnp.float32)
    actions2 = dqn_forward(state2, *params)
    jax.block_until_ready(actions2)
    assert actions2.shape == (1037, n_actions)
    assert jnp.allclose(actions2, reference(state2), atol=1e-5, rtol=1e-5)

    print("KERNEL_OK")
</pallas_src>

<mosaic_0001>
module attributes {stable_mosaic.version = 11 : i64} {
  func.func @_dqn_kernel(%arg0: i32, %arg1: memref<32x8xf32, #tpu.memory_space<vmem>>, %arg2: memref<8x32xf32, #tpu.memory_space<vmem>>, %arg3: memref<1x32xf32, #tpu.memory_space<vmem>>, %arg4: memref<32x32xf32, #tpu.memory_space<vmem>>, %arg5: memref<1x32xf32, #tpu.memory_space<vmem>>, %arg6: memref<32x4xf32, #tpu.memory_space<vmem>>, %arg7: memref<1x4xf32, #tpu.memory_space<vmem>>, %arg8: memref<32x4xf32, #tpu.memory_space<vmem>>) attributes {dimension_semantics = [#tpu.dimension_semantics<parallel>], iteration_bounds = array<i64: 1>, scalar_prefetch = 0 : i64, scratch_operands = 0 : i64, tpu.core_type = #tpu.core_type<tc>, window_params = [{transform_indices = @transform_0, window_bounds = array<i64: 32, 8>}, {pipeline_mode = #tpu.pipeline_mode<synchronous>, transform_indices = @transform_1, window_bounds = array<i64: 8, 32>}, {pipeline_mode = #tpu.pipeline_mode<synchronous>, transform_indices = @transform_2, window_bounds = array<i64: 1, 32>}, {pipeline_mode = #tpu.pipeline_mode<synchronous>, transform_indices = @transform_3, window_bounds = array<i64: 32, 32>}, {pipeline_mode = #tpu.pipeline_mode<synchronous>, transform_indices = @transform_4, window_bounds = array<i64: 1, 32>}, {pipeline_mode = #tpu.pipeline_mode<synchronous>, transform_indices = @transform_5, window_bounds = array<i64: 32, 4>}, {pipeline_mode = #tpu.pipeline_mode<synchronous>, transform_indices = @transform_6, window_bounds = array<i64: 1, 4>}, {transform_indices = @transform_7, window_bounds = array<i64: 32, 4>}]} {
    %c0 = arith.constant 0 : index
    %c0_0 = arith.constant 0 : index
    %0 = vector.load %arg1[%c0, %c0_0] : memref<32x8xf32, #tpu.memory_space<vmem>>, vector<32x8xf32>
    %c0_1 = arith.constant 0 : index
    %c0_2 = arith.constant 0 : index
    %1 = vector.load %arg2[%c0_1, %c0_2] : memref<8x32xf32, #tpu.memory_space<vmem>>, vector<8x32xf32>
    %cst = arith.constant dense<0.000000e+00> : vector<32x32xf32>
    %2 = tpu.matmul %0, %1, %cst {dimension_numbers = #tpu.dot_dimension_numbers<[1], [0], [0], [1], [0, 0, 1, 1], [], []>} : vector<32x8xf32>, vector<8x32xf32>, vector<32x32xf32> -> vector<32x32xf32>
    %c0_3 = arith.constant 0 : index
    %c0_4 = arith.constant 0 : index
    %3 = vector.load %arg3[%c0_3, %c0_4] : memref<1x32xf32, #tpu.memory_space<vmem>>, vector<1x32xf32>
    %4 = vector.broadcast %3 : vector<1x32xf32> to vector<32x32xf32>
    %5 = arith.addf %2, %4 : vector<32x32xf32>
    %cst_5 = arith.constant 0.000000e+00 : f32
    %6 = vector.broadcast %cst_5 : f32 to vector<32x32xf32>
    %7 = arith.maximumf %5, %6 : vector<32x32xf32>
    %c0_6 = arith.constant 0 : index
    %c0_7 = arith.constant 0 : index
    %8 = vector.load %arg4[%c0_6, %c0_7] : memref<32x32xf32, #tpu.memory_space<vmem>>, vector<32x32xf32>
    %cst_8 = arith.constant dense<0.000000e+00> : vector<32x32xf32>
    %9 = tpu.matmul %7, %8, %cst_8 {dimension_numbers = #tpu.dot_dimension_numbers<[1], [0], [0], [1], [0, 0, 1, 1], [], []>} : vector<32x32xf32>, vector<32x32xf32>, vector<32x32xf32> -> vector<32x32xf32>
    %c0_9 = arith.constant 0 : index
    %c0_10 = arith.constant 0 : index
    %10 = vector.load %arg5[%c0_9, %c0_10] : memref<1x32xf32, #tpu.memory_space<vmem>>, vector<1x32xf32>
    %11 = vector.broadcast %10 : vector<1x32xf32> to vector<32x32xf32>
    %12 = arith.addf %9, %11 : vector<32x32xf32>
    %cst_11 = arith.constant 0.000000e+00 : f32
    %13 = vector.broadcast %cst_11 : f32 to vector<32x32xf32>
    %14 = arith.maximumf %12, %13 : vector<32x32xf32>
    %c0_12 = arith.constant 0 : index
    %c0_13 = arith.constant 0 : index
    %15 = vector.load %arg6[%c0_12, %c0_13] : memref<32x4xf32, #tpu.memory_space<vmem>>, vector<32x4xf32>
    %cst_14 = arith.constant dense<0.000000e+00> : vector<32x4xf32>
    %16 = tpu.matmul %14, %15, %cst_14 {dimension_numbers = #tpu.dot_dimension_numbers<[1], [0], [0], [1], [0, 0, 1, 1], [], []>} : vector<32x32xf32>, vector<32x4xf32>, vector<32x4xf32> -> vector<32x4xf32>
    %c0_15 = arith.constant 0 : index
    %c0_16 = arith.constant 0 : index
    %17 = vector.load %arg7[%c0_15, %c0_16] : memref<1x4xf32, #tpu.memory_space<vmem>>, vector<1x4xf32>
    %18 = vector.broadcast %17 : vector<1x4xf32> to vector<32x4xf32>
    %19 = arith.addf %16, %18 : vector<32x4xf32>
    %c0_17 = arith.constant 0 : index
    %c0_18 = arith.constant 0 : index
    %20 = vector.load %arg8[%c0_17, %c0_18] : memref<32x4xf32, #tpu.memory_space<vmem>>, vector<32x4xf32>
    tpu.vector_store %arg8[%c0_17, %c0_18], %19 {strides = array<i32>} : memref<32x4xf32, #tpu.memory_space<vmem>>, vector<32x4xf32>,
    return
  }
  func.func @transform_0(%arg0: i32) -> (i32, i32) {
    %c0_i32 = arith.constant 0 : i32
    %c0_i32_0 = arith.constant 0 : i32
    return %arg0, %c0_i32 : i32, i32
  }
  func.func @transform_1(%arg0: i32) -> (i32, i32) {
    %c0_i32 = arith.constant 0 : i32
    %c0_i32_0 = arith.constant 0 : i32
    %c0_i32_1 = arith.constant 0 : i32
    return %c0_i32, %c0_i32_0 : i32, i32
  }
  func.func @transform_2(%arg0: i32) -> (i32, i32) {
    %c0_i32 = arith.constant 0 : i32
    %c0_i32_0 = arith.constant 0 : i32
    %c0_i32_1 = arith.constant 0 : i32
    return %c0_i32, %c0_i32_0 : i32, i32
  }
  func.func @transform_3(%arg0: i32) -> (i32, i32) {
    %c0_i32 = arith.constant 0 : i32
    %c0_i32_0 = arith.constant 0 : i32
    %c0_i32_1 = arith.constant 0 : i32
    return %c0_i32, %c0_i32_0 : i32, i32
  }
  func.func @transform_4(%arg0: i32) -> (i32, i32) {
    %c0_i32 = arith.constant 0 : i32
    %c0_i32_0 = arith.constant 0 : i32
    %c0_i32_1 = arith.constant 0 : i32
    return %c0_i32, %c0_i32_0 : i32, i32
  }
  func.func @transform_5(%arg0: i32) -> (i32, i32) {
    %c0_i32 = arith.constant 0 : i32
    %c0_i32_0 = arith.constant 0 : i32
    %c0_i32_1 = arith.constant 0 : i32
    return %c0_i32, %c0_i32_0 : i32, i32
  }
  func.func @transform_6(%arg0: i32) -> (i32, i32) {
    %c0_i32 = arith.constant 0 : i32
    %c0_i32_0 = arith.constant 0 : i32
    %c0_i32_1 = arith.constant 0 : i32
    return %c0_i32, %c0_i32_0 : i32, i32
  }
  func.func @transform_7(%arg0: i32) -> (i32, i32) {
    %c0_i32 = arith.constant 0 : i32
    %c0_i32_0 = arith.constant 0 : i32
    return %arg0, %c0_i32 : i32, i32
  }
}

</mosaic_0001>

<bundles_post_ra>
// kernel: dqn_forward.1
= control target key start
LH: loop header
LB: loop body
LE: loop exit
PB: predicated region body
PF: predicated region fallthrough
CT: control target
= control target key end

     0   :  { %vm35_vm0 = vcmask 64512   ;;  %vm89_vm1 = vcmask 261120   ;;  %vm184_vm2 = vcmask 31744   ;;  %s324_s1 = inlined_call_operand.vmem [shape: f32[8,32], index: 1, kind: input, shape index: {}]   ;;  %s325_s0 = inlined_call_operand.vmem [shape: f32[32,8], index: 0, kind: input, shape index: {}]   ;;  %s326_s3 = inlined_call_operand.vmem [shape: f32[32,32], index: 3, kind: input, shape index: {}]   ;;  %s327_s2 = inlined_call_operand.vmem [shape: f32[1,32], index: 2, kind: input, shape index: {}]   ;;  %s328_s4 = inlined_call_operand.vmem [shape: f32[1,32], index: 4, kind: input, shape index: {}]   ;;  %s329_s5 = inlined_call_operand.vmem [shape: f32[32,4], index: 5, kind: input, shape index: {}]   ;;  %s330_s6 = inlined_call_operand.vmem [shape: f32[1,4], index: 6, kind: input, shape index: {}]   ;;  %s331_s7 = inlined_call_operand.vmem [shape: f32[32,4], index: 7, kind: output, shape index: {}]  }
   0x1   :  { %v30_v0 = vld [vmem:[%s324_s1] sm:$0xff]  ;;  %v84_v2 = vld [vmem:[%s326_s3 + $0x18] sm:$0xff]  ;;  %v27_v3 = vld [vmem:[%s325_s0 + $0x8] sm:$0xff] }
   0x2   :  { %v26_v1 = vld [vmem:[%s325_s0] sm:$0xff]  ;;  %63 = vmatpush.msra.mxu0 %v30_v0  ;;  %114 = vmatpush.msra.mxu1 %v84_v2  ;;  %v28_v4 = vld [vmem:[%s325_s0 + $0x10] sm:$0xff]  ;;  %v29_v5 = vld [vmem:[%s325_s0 + $0x18] sm:$0xff] }
   0x3   :  { %193 = vmatmul.msk.f32.vlgmr.msra.gmra.mxu0 %vm35_vm0, %v26_v1  ;;  %205 = vmatpush.msra.mxu3 %v84_v2  ;;  %v83_v6 = vld [vmem:[%s326_s3 + $0x10] sm:$0xff]  ;;  %v82_v7 = vld [vmem:[%s326_s3 + $0x8] sm:$0xff]  ;;  %v81_v8 = vld [vmem:[%s326_s3] sm:$0xff] }
   0x4   :  { %115 = vmatpush.msra.mxu1 %v83_v6  ;;  %v213_v9 = vld [vmem:[%s327_s2] ss:$0 sm:$0xff]  ;;  %v138_v10 = vld [vmem:[%s329_s5 + $0x18] sm:$0xff]  ;;  %v137_v23 = vld [vmem:[%s329_s5 + $0x10] sm:$0xff] }
   0x5   :  { %206 = vmatpush.msra.mxu3 %v83_v6  ;;  %209 = vmatpush.msra.mxu2 %v138_v10  ;;  %v136_v24 = vld [vmem:[%s329_s5 + $0x8] sm:$0xff]  ;;  %v135_v25 = vld [vmem:[%s329_s5] sm:$0xff] }
   0x6   :  { %116 = vmatpush.msra.mxu1 %v82_v7  ;;  %v214_v26 = vld [vmem:[%s328_s4] ss:$0 sm:$0xff] }
   0x7   :  { %207 = vmatpush.msra.mxu3 %v82_v7  ;;  %210 = vmatpush.msra.mxu2 %v137_v23  ;;  %v215_v39 = vld [vmem:[%s330_s6] ss:$0 sm:$0xff] }
   0x8   :  { %117 = vmatpush.msra.mxu1 %v81_v8 }
   0x9   :  { %208 = vmatpush.msra.mxu3 %v81_v8  ;;  %211 = vmatpush.msra.mxu2 %v136_v24 }
   0xa   :  { %167 = vmatpush.msrb.mxu1 %v138_v10 }
   0xb   :  { %194 = vmatmul.msk.f32.gmra.mxu0 %vm35_vm0, %v27_v3  ;;  %212 = vmatpush.msra.mxu2 %v135_v25 }
   0xc   :  { %168 = vmatpush.msrb.mxu1 %v137_v23 }
   0xe   :  { %169 = vmatpush.msrb.mxu1 %v136_v24 }
  0x10   :  { %170 = vmatpush.msrb.mxu1 %v135_v25 }
  0x13   :  { %195 = vmatmul.msk.f32.gmra.mxu0 %vm35_vm0, %v28_v4 }
  0x1b   :  { %196 = vmatmul.msk.f32.gmra.mxu0 %vm35_vm0, %v29_v5 }
  0x80   :  { %v65_v11 = vpop.f32.mrf.mxu0 }
  0x81   :  { %v66_v12 = vadd.f32 %v213_v9, %v65_v11 }
  0x83   :  { %v77_v13 = vmax.f32 %v66_v12, 0.0 }
  0x85   :  { %197 = vmatmul.msk.f32.vlgmr.msra.gmra.mxu1 %vm89_vm1, %v77_v13 }
  0x88   :  { %v68_v14 = vpop.f32.mrf.mxu0 }
  0x89   :  { %v69_v15 = vadd.f32 %v213_v9, %v68_v14 }
  0x8b   :  { %v78_v16 = vmax.f32 %v69_v15, 0.0 }
  0x8d   :  { %198 = vmatmul.msk.f32.vlgmr.msra.gmra.mxu3 %vm89_vm1, %v78_v16 }
  0x90   :  { %v71_v17 = vpop.f32.mrf.mxu0 }
  0x91   :  { %v72_v18 = vadd.f32 %v213_v9, %v71_v17 }
  0x93   :  { %v79_v19 = vmax.f32 %v72_v18, 0.0 }
  0x95   :  { %199 = vmatmul.msk.f32.gmra.mxu3 %vm89_vm1, %v79_v19 }
  0x98   :  { %v74_v20 = vpop.f32.mrf.mxu0 }
  0x99   :  { %v75_v21 = vadd.f32 %v213_v9, %v74_v20 }
  0x9b   :  { %v80_v22 = vmax.f32 %v75_v21, 0.0 }
  0x9d   :  { %200 = vmatmul.msk.f32.gmra.mxu3 %vm89_vm1, %v80_v22 }
 0x102   :  { %v119_v27 = vpop.f32.mrf.mxu1 }
 0x103   :  { %v120_v28 = vadd.f32 %v214_v26, %v119_v27 }
 0x105   :  { %v131_v29 = vmax.f32 %v120_v28, 0.0 }
 0x107   :  { %201 = vmatmul.msk.f32.vlgmr.msrb.gmra.mxu1 %vm89_vm1, %v131_v29 }
 0x110   :  { %v122_v30 = vpop.f32.mrf.mxu3 }
 0x111   :  { %v123_v31 = vadd.f32 %v214_v26, %v122_v30 }
 0x113   :  { %v132_v32 = vmax.f32 %v123_v31, 0.0 }
 0x115   :  { %202 = vmatmul.msk.f32.vlgmr.msra.gmra.mxu2 %vm89_vm1, %v132_v32 }
 0x118   :  { %v125_v33 = vpop.f32.mrf.mxu3 }
 0x119   :  { %v126_v34 = vadd.f32 %v214_v26, %v125_v33 }
 0x11b   :  { %v133_v35 = vmax.f32 %v126_v34, 0.0 }
 0x11d   :  { %203 = vmatmul.msk.f32.gmra.mxu2 %vm89_vm1, %v133_v35 }
 0x120   :  { %v128_v36 = vpop.f32.mrf.mxu3 }
 0x121   :  { %v129_v37 = vadd.f32 %v214_v26, %v128_v36 }
 0x123   :  { %v134_v38 = vmax.f32 %v129_v37, 0.0 }
 0x125   :  { %204 = vmatmul.msk.f32.gmra.mxu2 %vm89_vm1, %v134_v38 }
 0x184   :  { %v172_v40 = vpop.f32.mrf.mxu1 }
 0x185   :  { %v173_v41 = vadd.f32 %v215_v39, %v172_v40 }
 0x187   :  { %185 = vst.msk [vmem:[%s331_s7] sm:$0xff] %vm184_vm2, %v173_v41 }
 0x198   :  { %v175_v42 = vpop.f32.mrf.mxu2 }
 0x199   :  { %v176_v43 = vadd.f32 %v215_v39, %v175_v42 }
 0x19b   :  { %186 = vst.msk [vmem:[%s331_s7 + $0x8] sm:$0xff] %vm184_vm2, %v176_v43 }
 0x1a0   :  { %v178_v44 = vpop.f32.mrf.mxu2 }
 0x1a1   :  { %v179_v45 = vadd.f32 %v215_v39, %v178_v44 }
 0x1a3   :  { %187 = vst.msk [vmem:[%s331_s7 + $0x10] sm:$0xff] %vm184_vm2, %v179_v45 }
 0x1a8   :  { %v181_v46 = vpop.f32.mrf.mxu2 }
 0x1a9   :  { %v182_v47 = vadd.f32 %v215_v39, %v181_v46 }
 0x1ab   :  { %188 = vst.msk [vmem:[%s331_s7 + $0x18] sm:$0xff] %vm184_vm2, %v182_v47 }

</bundles_post_ra>
